<compile_context>
chip_gen: v7x
topology: tpu7x:2x2x1
jax: 0.10.0
libtpu: 0.0.40
codegen_flags: <defaults>
</compile_context>

<pallas_src>
import math

import jax
import jax.numpy as jnp
from jax.experimental import pallas as pl
from jax.experimental.pallas import tpu as pltpu  # noqa: F401  (TPU backend)


def _round_up(x, m):
    return ((x + m - 1) // m) * m


# ----------------------------------------------------------------------------
# The single fused Pallas kernel
# ----------------------------------------------------------------------------
def _fused_kernel(x_ref, a1_ref, a2_ref, a3g_ref, wh_ref, bh_ref, o_ref):
    """conv1+relu -> conv2+relu -> conv3+GAP -> [wx|bx] heads, all in vregs."""
    x = x_ref[...].astype(jnp.bfloat16)                                   # [B, K1]
    h1 = jnp.dot(x, a1_ref[...], preferred_element_type=jnp.float32)      # [B, K2] f32
    h1 = jnp.maximum(h1, 0.0).astype(jnp.bfloat16)
    h2 = jnp.dot(h1, a2_ref[...], preferred_element_type=jnp.float32)     # [B, K3] f32
    h2 = jnp.maximum(h2, 0.0).astype(jnp.bfloat16)
    feat = jnp.dot(h2, a3g_ref[...], preferred_element_type=jnp.float32)  # [B, C]  f32
    out = jnp.dot(feat.astype(jnp.bfloat16), wh_ref[...],
                  preferred_element_type=jnp.float32) + bh_ref[...]       # [B, Nh] f32
    o_ref[...] = out


# ----------------------------------------------------------------------------
# Module
# ----------------------------------------------------------------------------
class PredWeightsPallas:
    def __init__(self, in_ch, out_ch, kernel_size, key):
        self.in_ch = in_ch
        self.out_ch = out_ch
        self.kernel_size = kernel_size
        self.padding = math.floor(kernel_size / 2)

        ks = jax.random.split(key, 7)

        def conv_init(k, shape):               # PyTorch-style uniform init
            fan_in = shape[1] * shape[2] * shape[3]
            bound = 1.0 / math.sqrt(fan_in)
            return jax.random.uniform(k, shape, jnp.float32, -bound, bound)

        def lin_init(kw, kb, out_f, in_f):
            bound = 1.0 / math.sqrt(in_f)
            W = jax.random.uniform(kw, (out_f, in_f), jnp.float32, -bound, bound)
            b = jax.random.uniform(kb, (out_f,), jnp.float32, -bound, bound)
            return W, b

        # PyTorch-layout parameters ([Cout, Cin, kh, kw] / [out_f, in_f]).
        self.w1 = conv_init(ks[0], (out_ch, in_ch, 5, 5))
        self.w2 = conv_init(ks[1], (out_ch, out_ch, 5, 5))
        self.w3 = conv_init(ks[2], (out_ch, out_ch, 3, 3))
        self.wx_W, self.wx_b = lin_init(
            ks[3], ks[4], out_ch * out_ch * kernel_size * kernel_size, out_ch)
        self.bx_W, self.bx_b = lin_init(ks[5], ks[6], out_ch, out_ch)

        # Concatenated [wx | bx] head, zero-padded to a 128-multiple of columns
        # so the final store is an unmasked, lane-dense vst.
        self.n_wx = out_ch * out_ch * kernel_size * kernel_size
        self.n_head = self.n_wx + out_ch
        self.n_head_pad = _round_up(self.n_head, 128)
        whead = jnp.concatenate([self.wx_W.T, self.bx_W.T], axis=1)        # [C, 584]
        bhead = jnp.concatenate([self.wx_b, self.bx_b])                    # [584]
        pad = self.n_head_pad - self.n_head
        self.whead = jnp.pad(whead, ((0, 0), (0, pad))).astype(jnp.bfloat16)
        self.bhead = jnp.pad(bhead, (0, pad)).reshape(1, -1).astype(jnp.float32)

        # Lazily-built, per-(H, W) linearised conv operators (exact; built once).
        self._conv_maps = {}

    # ---- conv -> dense GEMM operator (exact; identity-probing of the conv) ----
    @staticmethod
    def _linearize_conv(w_oihw, h, w, stride, pad):
        cin = w_oihw.shape[1]
        n = cin * h * w
        eye = jnp.eye(n, dtype=jnp.float32).reshape(n, cin, h, w)          # NCHW basis
        y = jax.lax.conv_general_dilated(
            eye, w_oihw, window_strides=(stride, stride),
            padding=[(pad, pad), (pad, pad)],
            dimension_numbers=("NCHW", "OIHW", "NCHW"))
        cout, ho, wo = y.shape[1], y.shape[2], y.shape[3]
        return y.reshape(n, cout * ho * wo), (ho, wo)

    def _get_conv_maps(self, H, W):
        key = (H, W)
        if key not in self._conv_maps:
            a1, (h1, w1) = self._linearize_conv(self.w1, H, W, 2, 2)
            a2, (h2, w2) = self._linearize_conv(self.w2, h1, w1, 2, 2)
            a3, (h3, w3) = self._linearize_conv(self.w3, h2, w2, 2, 1)
            s3 = h3 * w3
            # Global-average-pool folded into the conv3 operator (no bias/ReLU).
            a3g = a3.reshape(a3.shape[0], self.out_ch, s3).mean(axis=-1)   # [K3, C]
            self._conv_maps[key] = (a1.astype(jnp.bfloat16),
                                    a2.astype(jnp.bfloat16),
                                    a3g.astype(jnp.bfloat16))
        return self._conv_maps[key]

    # ---- forward -------------------------------------------------------------
    def __call__(self, feat_nchw):
        B, Cin, H, W = feat_nchw.shape
        assert Cin == self.in_ch
        a1, a2, a3g = self._get_conv_maps(H, W)
        x_flat = feat_nchw.reshape(B, Cin * H * W)           # free view (NCHW flatten)

        k1, k2 = a1.shape
        k3 = a2.shape[1]
        c = self.out_ch
        nh = self.n_head_pad
        flops = 2 * B * (k1 * k2 + k2 * k3 + k3 * c + c * nh)
        bytes_accessed = (x_flat.size * 4
                          + (a1.size + a2.size + a3g.size + self.whead.size) * 2
                          + self.bhead.size * 4 + B * nh * 4)

        out = pl.pallas_call(
            _fused_kernel,
            out_shape=jax.ShapeDtypeStruct((B, nh), jnp.float32),
            cost_estimate=pl.CostEstimate(flops=flops, transcendentals=0,
                                          bytes_accessed=bytes_accessed),
        )(x_flat, a1, a2, a3g, self.whead, self.bhead)

        wx = out[:, :self.n_wx].reshape(B, self.out_ch, self.out_ch,
                                        self.kernel_size, self.kernel_size)
        bx = out[:, self.n_wx:self.n_wx + self.out_ch].reshape(B, self.out_ch, 1, 1)
        return wx, bx


# ----------------------------------------------------------------------------
# Pure-JAX f32 reference (matches the PyTorch module)
# ----------------------------------------------------------------------------
def _reference_forward(model, feat_nchw):
    def conv(x, w, stride, pad):
        return jax.lax.conv_general_dilated(
            x, w, (stride, stride), [(pad, pad), (pad, pad)],
            dimension_numbers=("NCHW", "OIHW", "NCHW"))

    y = jax.nn.relu(conv(feat_nchw, model.w1, 2, 2))
    y = jax.nn.relu(conv(y, model.w2, 2, 2))
    y = conv(y, model.w3, 2, 1)
    feat = jnp.mean(y, axis=(2, 3))                          # adaptive_avg_pool2d (1,1)
    B = feat_nchw.shape[0]
    wx = (feat @ model.wx_W.T + model.wx_b).reshape(
        B, model.out_ch, model.out_ch, model.kernel_size, model.kernel_size)
    bx = (feat @ model.bx_W.T + model.bx_b).reshape(B, model.out_ch, 1, 1)
    return wx, bx


# ----------------------------------------------------------------------------
if __name__ == "__main__":
    key = jax.random.PRNGKey(0)
    k_params, k_x = jax.random.split(key)

    in_ch, out_ch, kernel_size = 4, 8, 3
    model = PredWeightsPallas(in_ch, out_ch, kernel_size, k_params)

    feat = jax.random.normal(k_x, (2, in_ch, 16, 16), jnp.float32)   # NCHW
    wx, bx = model(feat)
    jax.block_until_ready((wx, bx))

    assert wx.shape == (2, out_ch, out_ch, kernel_size, kernel_size)
    assert bx.shape == (2, out_ch, 1, 1)
    assert wx.dtype == jnp.float32 and bx.dtype == jnp.float32

    # Correctness vs. the f32 reference (bf16 MXU operands -> loose tolerance).
    wx_ref, bx_ref = _reference_forward(model, feat)

    def max_rel(a, b):
        return float(jnp.max(jnp.abs(a - b)) / (jnp.max(jnp.abs(b)) + 1e-6))

    assert max_rel(wx, wx_ref) < 5e-2, ("wx mismatch", max_rel(wx, wx_ref))
    assert max_rel(bx, bx_ref) < 5e-2, ("bx mismatch", max_rel(bx, bx_ref))

    print("KERNEL_OK")
</pallas_src>

<mosaic_0001>
module attributes {stable_mosaic.version = 11 : i64} {
  func.func @_fused_kernel(%arg0: memref<2x1024xf32, #tpu.memory_space<vmem>>, %arg1: memref<1024x512xbf16, #tpu.memory_space<vmem>>, %arg2: memref<512x128xbf16, #tpu.memory_space<vmem>>, %arg3: memref<128x8xbf16, #tpu.memory_space<vmem>>, %arg4: memref<8x640xbf16, #tpu.memory_space<vmem>>, %arg5: memref<1x640xf32, #tpu.memory_space<vmem>>, %arg6: memref<2x640xf32, #tpu.memory_space<vmem>>) attributes {dimension_semantics = [], scalar_prefetch = 0 : i64, scratch_operands = 0 : i64, tpu.core_type = #tpu.core_type<tc>} {
    %c0 = arith.constant 0 : index
    %c0_0 = arith.constant 0 : index
    %0 = vector.load %arg0[%c0, %c0_0] : memref<2x1024xf32, #tpu.memory_space<vmem>>, vector<2x1024xf32>
    %1 = arith.truncf %0 : vector<2x1024xf32> to vector<2x1024xbf16>
    %c0_1 = arith.constant 0 : index
    %c0_2 = arith.constant 0 : index
    %2 = vector.load %arg1[%c0_1, %c0_2] : memref<1024x512xbf16, #tpu.memory_space<vmem>>, vector<1024x512xbf16>
    %cst = arith.constant dense<0.000000e+00> : vector<2x512xf32>
    %3 = tpu.matmul %1, %2, %cst {dimension_numbers = #tpu.dot_dimension_numbers<[1], [0], [0], [1], [0, 0, 1, 1], [], []>} : vector<2x1024xbf16>, vector<1024x512xbf16>, vector<2x512xf32> -> vector<2x512xf32>
    %cst_3 = arith.constant 0.000000e+00 : f32
    %4 = vector.broadcast %cst_3 : f32 to vector<2x512xf32>
    %5 = arith.maximumf %3, %4 : vector<2x512xf32>
    %6 = arith.truncf %5 : vector<2x512xf32> to vector<2x512xbf16>
    %c0_4 = arith.constant 0 : index
    %c0_5 = arith.constant 0 : index
    %7 = vector.load %arg2[%c0_4, %c0_5] : memref<512x128xbf16, #tpu.memory_space<vmem>>, vector<512x128xbf16>
    %cst_6 = arith.constant dense<0.000000e+00> : vector<2x128xf32>
    %8 = tpu.matmul %6, %7, %cst_6 {dimension_numbers = #tpu.dot_dimension_numbers<[1], [0], [0], [1], [0, 0, 1, 1], [], []>} : vector<2x512xbf16>, vector<512x128xbf16>, vector<2x128xf32> -> vector<2x128xf32>
    %cst_7 = arith.constant 0.000000e+00 : f32
    %9 = vector.broadcast %cst_7 : f32 to vector<2x128xf32>
    %10 = arith.maximumf %8, %9 : vector<2x128xf32>
    %11 = arith.truncf %10 : vector<2x128xf32> to vector<2x128xbf16>
    %c0_8 = arith.constant 0 : index
    %c0_9 = arith.constant 0 : index
    %12 = vector.load %arg3[%c0_8, %c0_9] : memref<128x8xbf16, #tpu.memory_space<vmem>>, vector<128x8xbf16>
    %cst_10 = arith.constant dense<0.000000e+00> : vector<2x8xf32>
    %13 = tpu.matmul %11, %12, %cst_10 {dimension_numbers = #tpu.dot_dimension_numbers<[1], [0], [0], [1], [0, 0, 1, 1], [], []>} : vector<2x128xbf16>, vector<128x8xbf16>, vector<2x8xf32> -> vector<2x8xf32>
    %14 = arith.truncf %13 : vector<2x8xf32> to vector<2x8xbf16>
    %c0_11 = arith.constant 0 : index
    %c0_12 = arith.constant 0 : index
    %15 = vector.load %arg4[%c0_11, %c0_12] : memref<8x640xbf16, #tpu.memory_space<vmem>>, vector<8x640xbf16>
    %cst_13 = arith.constant dense<0.000000e+00> : vector<2x640xf32>
    %16 = tpu.matmul %14, %15, %cst_13 {dimension_numbers = #tpu.dot_dimension_numbers<[1], [0], [0], [1], [0, 0, 1, 1], [], []>} : vector<2x8xbf16>, vector<8x640xbf16>, vector<2x640xf32> -> vector<2x640xf32>
    %c0_14 = arith.constant 0 : index
    %c0_15 = arith.constant 0 : index
    %17 = vector.load %arg5[%c0_14, %c0_15] : memref<1x640xf32, #tpu.memory_space<vmem>>, vector<1x640xf32>
    %18 = vector.broadcast %17 : vector<1x640xf32> to vector<2x640xf32>
    %19 = arith.addf %16, %18 : vector<2x640xf32>
    %c0_16 = arith.constant 0 : index
    %c0_17 = arith.constant 0 : index
    %20 = vector.load %arg6[%c0_16, %c0_17] : memref<2x640xf32, #tpu.memory_space<vmem>>, vector<2x640xf32>
    tpu.vector_store %arg6[%c0_16, %c0_17], %19 {strides = array<i32>} : memref<2x640xf32, #tpu.memory_space<vmem>>, vector<2x640xf32>,
    return
  }
}

</mosaic_0001>

<bundles_post_ra>
// kernel: tpu_custom_call.1
= control target key start
LH: loop header
LB: loop body
LE: loop exit
PB: predicated region body
PF: predicated region fallthrough
CT: control target
= control target key end

     0   :  { %11 = vsyncpa [#allocation3], 0  ;;  %s3763_s0 = inlined_call_operand.vmem [shape: f32[2,1024], index: 0, kind: input, shape index: {}]   ;;  %s3764_s1 = inlined_call_operand.hbm [shape: bf16[1024,512], index: 1, kind: input, shape index: {}]   ;;  %s3765_s2 = inlined_call_operand.hbm [shape: bf16[512,128], index: 2, kind: input, shape index: {}]   ;;  %s3766_s3 = inlined_call_operand.vmem [shape: bf16[128,8], index: 3, kind: input, shape index: {}]   ;;  %s3767_s4 = inlined_call_operand.vmem [shape: bf16[8,640], index: 4, kind: input, shape index: {}]   ;;  %s3768_s5 = inlined_call_operand.vmem [shape: f32[1,640], index: 5, kind: input, shape index: {}]   ;;  %s3769_s6 = inlined_call_operand.hbm [shape: f32[2,640], index: 6, kind: output, shape index: {}]  }
   0x1   :  { %12 = vsyncpa [#allocation6], 0 }
   0x2   :  { %13 = vsyncpa [#allocation4], 0  ;;  %s3582_s21 = smov [#allocation2]   ;;  %s3510_s25 = scalar_lea.hbm %s3764_s1, 32768 }
   0x3   :  { %s21_s22 = sshll.u32 %s3582_s21, 4  ;;  %p3511_p0 = scmp.ne.s32.totalorder %s3764_s1, %s3510_s25  ;;  %s22_s22 = int_to_ptr.vmem [resolvable:$true] %s21_s22 }
   0x4   :  { %p3514_p1 = scmp.lt.u32.totalorder %s3510_s25, %s3764_s1 }
   0x6   :  { %p3516_p2 = pnand %p3514_p1, %p3511_p0 }
   0x8   :  { %3519 = shalt.err (!%p3516_p2)
}
   0x9   :  { %s3520_s30 = scalar_lea.vmem %s22_s22, 32768  ;;  %p3525_p4 = scmp.lt.s32.totalorder %s22_s22, %s22_s22 }
   0xa   :  { %p3521_p3 = scmp.ne.s32.totalorder %s22_s22, %s3520_s30  ;;  %p3526_p5 = scmp.lt.s32.totalorder %s3520_s30, %s3520_s30 }
   0xc   :  { %p3527_p6 = por %p3526_p5, %p3525_p4 }
   0xe   :  { %p3528_p7 = pnand %p3527_p6, %p3521_p3 }
  0x10   :  { %3531 = shalt.err (!%p3528_p7)
}
  0x11   :  { %s3583_s7 = smov 256   ;;  %s3584_s8 = smov 16  }
  0x12   :  { %27 = dma.hbm_to_vmem [thread:$0]  %s3764_s1, 32768, %s22_s22, [#allocation3], %s3583_s7, %s3583_s7, %s3584_s8  }
  0x13   :  { %s3585_s11 = smov [#allocation5]   ;;  %s3532_s15 = scalar_lea.hbm %s3765_s2, 4096 }
  0x14   :  { %s33_s12 = sshll.u32 %s3585_s11, 4  ;;  %p3533_p8 = scmp.ne.s32.totalorder %s3765_s2, %s3532_s15  ;;  %s34_s12 = int_to_ptr.vmem [resolvable:$true] %s33_s12 }
  0x15   :  { %p3536_p9 = scmp.lt.u32.totalorder %s3532_s15, %s3765_s2 }
  0x17   :  { %p3538_p10 = pnand %p3536_p9, %p3533_p8 }
  0x19   :  { %3541 = shalt.err (!%p3538_p10)
}
  0x1a   :  { %s3542_s20 = scalar_lea.vmem %s34_s12, 4096  ;;  %p3547_p12 = scmp.lt.s32.totalorder %s34_s12, %s34_s12 }
  0x1b   :  { %p3543_p11 = scmp.ne.s32.totalorder %s34_s12, %s3542_s20  ;;  %p3548_p13 = scmp.lt.s32.totalorder %s3542_s20, %s3542_s20 }
  0x1d   :  { %p3549_p0 = por %p3548_p13, %p3547_p12 }
  0x1f   :  { %p3550_p1 = pnand %p3549_p0, %p3543_p11 }
  0x21   :  { %3553 = shalt.err (!%p3550_p1)
}
  0x22   :  { %s3586_s1 = smov 64   ;;  %s3587_s21 = smov 4  }
  0x23   :  { %39 = dma.hbm_to_vmem [thread:$0]  %s3765_s2, 4096, %s34_s12, [#allocation6], %s3586_s1, %s3586_s1, %s3587_s21  }
  0x24   :  { %3576 = dma.done.wait [#allocation3], 32768  }
  0x25   :  { %3577 = vsyncadd [#allocation3], 4294934528 }
  0x26   :  { %3578 = dma.done.wait [#allocation6], 4096  }
  0x27   :  { %3579 = vsyncadd [#allocation6], 4294963200  ;;  %v3079_v0 = vld [vmem:[#allocation2 + $0x4] ss:$16 sps:$4 sm:$0xff]   ;;  %v3081_v1 = vld [vmem:[#allocation2 + $0xc] ss:$16 sps:$4 sm:$0xff]   ;;  %v61_v38 = vlaneseq }
  0x28   :  { %1643 = vmatprep.subr.bf16.mxu0 %v3079_v0  ;;  %v3083_v2 = vld [vmem:[#allocation2] ss:$16 sps:$4 sm:$0xff]   ;;  %v3084_v3 = vld [vmem:[#allocation2 + $0x8] ss:$16 sps:$4 sm:$0xff]   ;;  %1807 = vmatprep.subr.bf16.mxu1 %v3081_v1  ;;  %v3085_v4 = vld [vmem:[#allocation2 + $0x24] ss:$16 sps:$4 sm:$0xff]  }
  0x29   :  { %1644 = vmatpush1.bf16.msra.mxu0 %v3083_v2  ;;  %1808 = vmatpush1.bf16.msra.mxu1 %v3084_v3  ;;  %v3087_v5 = vld [vmem:[#allocation2 + $0x2c] ss:$16 sps:$4 sm:$0xff]   ;;  %v3089_v6 = vld [vmem:[#allocation2 + $0x20] ss:$16 sps:$4 sm:$0xff]   ;;  %v3090_v7 = vld [vmem:[#allocation2 + $0x28] ss:$16 sps:$4 sm:$0xff]  }
  0x2a   :  { %1645 = vmatprep.subr.bf16.mxu0 %v3085_v4  ;;  %1809 = vmatprep.subr.bf16.mxu1 %v3087_v5  ;;  %v3091_v8 = vld [vmem:[#allocation2 + $0x44] ss:$16 sps:$4 sm:$0xff]   ;;  %v3093_v9 = vld [vmem:[#allocation2 + $0x4c] ss:$16 sps:$4 sm:$0xff]   ;;  %v3095_v10 = vld [vmem:[#allocation2 + $0x40] ss:$16 sps:$4 sm:$0xff]  }
  0x2b   :  { %v3096_v11 = vld [vmem:[#allocation2 + $0x48] ss:$16 sps:$4 sm:$0xff]   ;;  %v3097_v12 = vld [vmem:[#allocation2 + $0x64] ss:$16 sps:$4 sm:$0xff]   ;;  %v3099_v13 = vld [vmem:[#allocation2 + $0x6c] ss:$16 sps:$4 sm:$0xff]  }
  0x2c   :  { %v3101_v14 = vld [vmem:[#allocation2 + $0x60] ss:$16 sps:$4 sm:$0xff]   ;;  %v3102_v15 = vld [vmem:[#allocation2 + $0x68] ss:$16 sps:$4 sm:$0xff]   ;;  %v3103_v16 = vld [vmem:[#allocation2 + $0x84] ss:$16 sps:$4 sm:$0xff]  }
  0x2d   :  { %1646 = vmatpush1.bf16.msra.mxu0 %v3089_v6  ;;  %1810 = vmatpush1.bf16.msra.mxu1 %v3090_v7  ;;  %v3105_v17 = vld [vmem:[#allocation2 + $0x8c] ss:$16 sps:$4 sm:$0xff]   ;;  %v3107_v18 = vld [vmem:[#allocation2 + $0x80] ss:$16 sps:$4 sm:$0xff]   ;;  %v3108_v19 = vld [vmem:[#allocation2 + $0x88] ss:$16 sps:$4 sm:$0xff]  }
  0x2e   :  { %1647 = vmatprep.subr.bf16.mxu0 %v3091_v8  ;;  %1811 = vmatprep.subr.bf16.mxu1 %v3093_v9  ;;  %v3109_v20 = vld [vmem:[#allocation2 + $0xa4] ss:$16 sps:$4 sm:$0xff]   ;;  %v3111_v21 = vld [vmem:[#allocation2 + $0xac] ss:$16 sps:$4 sm:$0xff]   ;;  %v3113_v22 = vld [vmem:[#allocation2 + $0xa0] ss:$16 sps:$4 sm:$0xff]  }
  0x2f   :  { %v3114_v23 = vld [vmem:[#allocation2 + $0xa8] ss:$16 sps:$4 sm:$0xff]   ;;  %v3115_v24 = vld [vmem:[#allocation2 + $0xc4] ss:$16 sps:$4 sm:$0xff]   ;;  %v3117_v25 = vld [vmem:[#allocation2 + $0xcc] ss:$16 sps:$4 sm:$0xff]  }
  0x30   :  { %v3119_v26 = vld [vmem:[#allocation2 + $0xc0] ss:$16 sps:$4 sm:$0xff]   ;;  %v3120_v27 = vld [vmem:[#allocation2 + $0xc8] ss:$16 sps:$4 sm:$0xff]   ;;  %v3121_v28 = vld [vmem:[#allocation2 + $0xe4] ss:$16 sps:$4 sm:$0xff]  }
  0x31   :  { %1648 = vmatpush1.bf16.msra.mxu0 %v3095_v10  ;;  %1812 = vmatpush1.bf16.msra.mxu1 %v3096_v11  ;;  %v3123_v29 = vld [vmem:[#allocation2 + $0xec] ss:$16 sps:$4 sm:$0xff]   ;;  %v3125_v30 = vld [vmem:[#allocation2 + $0xe0] ss:$16 sps:$4 sm:$0xff]   ;;  %v3126_v31 = vld [vmem:[#allocation2 + $0xe8] ss:$16 sps:$4 sm:$0xff]  }
  0x32   :  { %1649 = vmatprep.subr.bf16.mxu0 %v3097_v12  ;;  %1813 = vmatprep.subr.bf16.mxu1 %v3099_v13  ;;  %v3127_v32 = vld [vmem:[#allocation2 + $0x104] ss:$16 sps:$4 sm:$0xff]   ;;  %v3129_v33 = vld [vmem:[#allocation2 + $0x10c] ss:$16 sps:$4 sm:$0xff]   ;;  %v3131_v34 = vld [vmem:[#allocation2 + $0x100] ss:$16 sps:$4 sm:$0xff]  }
  0x33   :  { %v3132_v35 = vld [vmem:[#allocation2 + $0x108] ss:$16 sps:$4 sm:$0xff]   ;;  %v3588_v36 = vmov 1983009808   ;;  %v3133_v39 = vld [vmem:[#allocation2 + $0x124] ss:$16 sps:$4 sm:$0xff]  }
  0x34   :  { %v59_v37 = vunpack.c.l.s4 %v3588_v36  ;;  %v3135_v40 = vld [vmem:[#allocation2 + $0x12c] ss:$16 sps:$4 sm:$0xff]   ;;  %v3137_v41 = vld [vmem:[#allocation2 + $0x120] ss:$16 sps:$4 sm:$0xff]   ;;  %v3652_v43 = vshrl.u32 %v61_v38, 7  ;;  %vm3590_vm0 = vmmov 0  }
  0x35   :  { %1650 = vmatpush1.bf16.msra.mxu0 %v3101_v14  ;;  %1814 = vmatpush1.bf16.msra.mxu1 %v3102_v15  ;;  %v3138_v44 = vld [vmem:[#allocation2 + $0x128] ss:$16 sps:$4 sm:$0xff]   ;;  %v3139_v45 = vld [vmem:[#allocation2 + $0x144] ss:$16 sps:$4 sm:$0xff]   ;;  %v3141_v46 = vld [vmem:[#allocation2 + $0x14c] ss:$16 sps:$4 sm:$0xff]  }
  0x36   :  { %1651 = vmatprep.subr.bf16.mxu0 %v3103_v16  ;;  %1815 = vmatprep.subr.bf16.mxu1 %v3105_v17  ;;  %v60_v42 = vunpack.c.0.s8 %v59_v37  ;;  %v3143_v47 = vld [vmem:[#allocation2 + $0x140] ss:$16 sps:$4 sm:$0xff]   ;;  %v3144_v48 = vld [vmem:[#allocation2 + $0x148] ss:$16 sps:$4 sm:$0xff]   ;;  %v3145_v50 = vld [vmem:[#allocation2 + $0x164] ss:$16 sps:$4 sm:$0xff]  }
  0x37   :  { %v3147_v51 = vld [vmem:[#allocation2 + $0x16c] ss:$16 sps:$4 sm:$0xff]   ;;  %v53_v52 = vld [vmem:[%s3763_s0] sm:$0xff]  ;;  %v3150_v55 = vld [vmem:[#allocation2 + $0x168] ss:$16 sps:$4 sm:$0xff]   ;;  %vm2469_vm1 = vcmask 1043456  }
  0x38   :  { %v3655_v49 = vsub.s32 %v60_v42, %v3652_v43  ;;  %v3149_v53 = vld [vmem:[#allocation2 + $0x160] ss:$16 sps:$4 sm:$0xff]   ;;  %v3151_v56 = vld [vmem:[#allocation2 + $0x184] ss:$16 sps:$4 sm:$0xff]   ;;  %v3153_v57 = vld [vmem:[#allocation2 + $0x18c] ss:$16 sps:$4 sm:$0xff]   ;;  %v57_v4 = vcombine.high %v53_v52, %v53_v52 }
  0x39   :  { %1652 = vmatpush1.bf16.msra.mxu0 %v3107_v18  ;;  %1816 = vmatpush1.bf16.msra.mxu1 %v3108_v19  ;;  %v3155_v59 = vld [vmem:[#allocation2 + $0x180] ss:$16 sps:$4 sm:$0xff]   ;;  %v3156_v61 = vld [vmem:[#allocation2 + $0x188] ss:$16 sps:$4 sm:$0xff]   ;;  %v3157_v62 = vld [vmem:[#allocation2 + $0x1a4] ss:$16 sps:$4 sm:$0xff]  }
  0x3a   :  { %1653 = vmatprep.subr.bf16.mxu0 %v3109_v20  ;;  %1817 = vmatprep.subr.bf16.mxu1 %v3111_v21  ;;  %v64_v54 = vrot.slane %v53_v52, %v3655_v49  ;;  %v3159_v63 = vld [vmem:[#allocation2 + $0x1ac] ss:$16 sps:$4 sm:$0xff]   ;;  %v3161_v0 = vld [vmem:[#allocation2 + $0x1a0] ss:$16 sps:$4 sm:$0xff]   ;;  %v3162_v1 = vld [vmem:[#allocation2 + $0x1a8] ss:$16 sps:$4 sm:$0xff]   ;;  %v3662_v9 = vrot.slane %v57_v4, %v3655_v49 }
  0x3b   :  { %v3163_v2 = vld [vmem:[#allocation2 + $0x1c4] ss:$16 sps:$4 sm:$0xff]   ;;  %v3165_v3 = vld [vmem:[#allocation2 + $0x1cc] ss:$16 sps:$4 sm:$0xff]   ;;  %v3167_v5 = vld [vmem:[#allocation2 + $0x1c0] ss:$16 sps:$4 sm:$0xff]  }
  0x3c   :  { %v72_v58 = vcombine.high %v64_v54, %v64_v54  ;;  %v3168_v6 = vld [vmem:[#allocation2 + $0x1c8] ss:$16 sps:$4 sm:$0xff]   ;;  %v3169_v7 = vld [vmem:[#allocation2 + $0x1e4] ss:$16 sps:$4 sm:$0xff]   ;;  %v3171_v8 = vld [vmem:[#allocation2 + $0x1ec] ss:$16 sps:$4 sm:$0xff]   ;;  %v73_v14 = vcombine.high %v3662_v9, %v3662_v9  ;;  %v99_v16 = vpack.c.bf16 %v64_v54, %v64_v54 }
  0x3d   :  { %1654 = vmatpush1.bf16.msra.mxu0 %v3113_v22  ;;  %1818 = vmatpush1.bf16.msra.mxu1 %v3114_v23  ;;  %v3173_v10 = vld [vmem:[#allocation2 + $0x1e0] ss:$16 sps:$4 sm:$0xff]   ;;  %v3174_v11 = vld [vmem:[#allocation2 + $0x1e8] ss:$16 sps:$4 sm:$0xff]   ;;  %v3178_v12 = vld [vmem:[#allocation2 + $0x204] ss:$16 sps:$4 sm:$0xff]  }
  0x3e   :  { %1655 = vmatprep.subr.bf16.mxu0 %v3115_v24  ;;  %1819 = vmatprep.subr.bf16.mxu1 %v3117_v25  ;;  %v100_v60 = vpack.c.bf16 %v72_v58, %v72_v58  ;;  %v3181_v13 = vld [vmem:[#allocation2 + $0x20c] ss:$16 sps:$4 sm:$0xff]   ;;  %v3176_v15 = vld [vmem:[#allocation2 + $0x200] ss:$16 sps:$4 sm:$0xff]   ;;  %v3179_v17 = vld [vmem:[#allocation2 + $0x208] ss:$16 sps:$4 sm:$0xff]   ;;  %v102_v20 = vpack.c.bf16 %v73_v14, %v73_v14 }
  0x3f   :  { %v3184_v18 = vld [vmem:[#allocation2 + $0x224] ss:$16 sps:$4 sm:$0xff]   ;;  %v3187_v19 = vld [vmem:[#allocation2 + $0x22c] ss:$16 sps:$4 sm:$0xff]   ;;  %v3182_v21 = vld [vmem:[#allocation2 + $0x220] ss:$16 sps:$4 sm:$0xff]  }
  0x40   :  { %1675 = vmatprep.mubr.bf16.mxu0 %v100_v60  ;;  %1839 = vmatprep.mubr.bf16.mxu1 %v100_v60  ;;  %v3185_v22 = vld [vmem:[#allocation2 + $0x228] ss:$16 sps:$4 sm:$0xff]   ;;  %v3190_v23 = vld [vmem:[#allocation2 + $0x244] ss:$16 sps:$4 sm:$0xff]   ;;  %v3193_v24 = vld [vmem:[#allocation2 + $0x24c] ss:$16 sps:$4 sm:$0xff]  }
  0x41   :  { %1656 = vmatpush1.bf16.msra.mxu0 %v3119_v26  ;;  %1820 = vmatpush1.bf16.msra.mxu1 %v3120_v27  ;;  %v3188_v25 = vld [vmem:[#allocation2 + $0x240] ss:$16 sps:$4 sm:$0xff]   ;;  %v3191_v26 = vld [vmem:[#allocation2 + $0x248] ss:$16 sps:$4 sm:$0xff]   ;;  %v3196_v27 = vld [vmem:[#allocation2 + $0x264] ss:$16 sps:$4 sm:$0xff]  }
  0x42   :  { %1657 = vmatprep.subr.bf16.mxu0 %v3121_v28  ;;  %1821 = vmatprep.subr.bf16.mxu1 %v3123_v29  ;;  %v3199_v28 = vld [vmem:[#allocation2 + $0x26c] ss:$16 sps:$4 sm:$0xff]   ;;  %v3194_v29 = vld [vmem:[#allocation2 + $0x260] ss:$16 sps:$4 sm:$0xff]   ;;  %v3209_v38 = vld [vmem:[#allocation2 + $0x2a8] ss:$16 sps:$4 sm:$0xff]  }
  0x43   :  { %v3211_v36 = vld [vmem:[#allocation2 + $0x2ac] ss:$16 sps:$4 sm:$0xff]   ;;  %v3206_v37 = vld [vmem:[#allocation2 + $0x2a0] ss:$16 sps:$4 sm:$0xff]   ;;  %v3215_v42 = vld [vmem:[#allocation2 + $0x2c8] ss:$16 sps:$4 sm:$0xff]  }
  0x44   :  { %v3227_v52 = vld [vmem:[#allocation2 + $0x308] ss:$16 sps:$4 sm:$0xff]   ;;  %v3235_v54 = vld [vmem:[#allocation2 + $0x32c] ss:$16 sps:$4 sm:$0xff]   ;;  %v3268_v14 = vld [vmem:[#allocation2 + $0x3e4] ss:$16 sps:$4 sm:$0xff]  }
  0x45   :  { %1658 = vmatpush1.bf16.msra.mxu0 %v3125_v30  ;;  %1822 = vmatpush1.bf16.msra.mxu1 %v3126_v31  ;;  %v3197_v30 = vld [vmem:[#allocation2 + $0x268] ss:$16 sps:$4 sm:$0xff]   ;;  %v3202_v31 = vld [vmem:[#allocation2 + $0x284] ss:$16 sps:$4 sm:$0xff]   ;;  %v3241_v58 = vld [vmem:[#allocation2 + $0x34c] ss:$16 sps:$4 sm:$0xff]  }
  0x46   :  { %1659 = vmatprep.subr.bf16.mxu0 %v3127_v32  ;;  %1823 = vmatprep.subr.bf16.mxu1 %v3129_v33  ;;  %v3205_v32 = vld [vmem:[#allocation2 + $0x28c] ss:$16 sps:$4 sm:$0xff]   ;;  %v3200_v33 = vld [vmem:[#allocation2 + $0x280] ss:$16 sps:$4 sm:$0xff]   ;;  %v3239_v60 = vld [vmem:[#allocation2 + $0x348] ss:$16 sps:$4 sm:$0xff]  }
  0x47   :  { %v3251_v4 = vld [vmem:[#allocation2 + $0x388] ss:$16 sps:$4 sm:$0xff]   ;;  %vm2465_vm2 = vcmask 64512  }
  0x49   :  { %1660 = vmatpush1.bf16.msra.mxu0 %v3131_v34  ;;  %1824 = vmatpush1.bf16.msra.mxu1 %v3132_v35  ;;  %v3203_v34 = vld [vmem:[#allocation2 + $0x288] ss:$16 sps:$4 sm:$0xff]   ;;  %v3208_v35 = vld [vmem:[#allocation2 + $0x2a4] ss:$16 sps:$4 sm:$0xff]  }
  0x4a   :  { %1661 = vmatprep.subr.bf16.mxu0 %v3133_v39  ;;  %1825 = vmatprep.subr.bf16.mxu1 %v3135_v40  ;;  %v3214_v39 = vld [vmem:[#allocation2 + $0x2c4] ss:$16 sps:$4 sm:$0xff]   ;;  %v3217_v40 = vld [vmem:[#allocation2 + $0x2cc] ss:$16 sps:$4 sm:$0xff]  }
  0x4d   :  { %1662 = vmatpush1.bf16.msra.mxu0 %v3137_v41  ;;  %1826 = vmatpush1.bf16.msra.mxu1 %v3138_v44  ;;  %v3212_v41 = vld [vmem:[#allocation2 + $0x2c0] ss:$16 sps:$4 sm:$0xff]   ;;  %v3220_v44 = vld [vmem:[#allocation2 + $0x2e4] ss:$16 sps:$4 sm:$0xff]  }
  0x4e   :  { %1663 = vmatprep.subr.bf16.mxu0 %v3139_v45  ;;  %1827 = vmatprep.subr.bf16.mxu1 %v3141_v46  ;;  %v3223_v45 = vld [vmem:[#allocation2 + $0x2ec] ss:$16 sps:$4 sm:$0xff]   ;;  %v3218_v46 = vld [vmem:[#allocation2 + $0x2e0] ss:$16 sps:$4 sm:$0xff]  }
  0x51   :  { %1664 = vmatpush1.bf16.msra.mxu0 %v3143_v47  ;;  %1828 = vmatpush1.bf16.msra.mxu1 %v3144_v48  ;;  %v3221_v47 = vld [vmem:[#allocation2 + $0x2e8] ss:$16 sps:$4 sm:$0xff]   ;;  %v3226_v48 = vld [vmem:[#allocation2 + $0x304] ss:$16 sps:$4 sm:$0xff]  }
  0x52   :  { %1665 = vmatprep.subr.bf16.mxu0 %v3145_v50  ;;  %1829 = vmatprep.subr.bf16.mxu1 %v3147_v51  ;;  %v3229_v50 = vld [vmem:[#allocation2 + $0x30c] ss:$16 sps:$4 sm:$0xff]   ;;  %v3224_v51 = vld [vmem:[#allocation2 + $0x300] ss:$16 sps:$4 sm:$0xff]  }
  0x55   :  { %1666 = vmatpush1.bf16.msra.mxu0 %v3149_v53  ;;  %1830 = vmatpush1.bf16.msra.mxu1 %v3150_v55  ;;  %v3232_v53 = vld [vmem:[#allocation2 + $0x324] ss:$16 sps:$4 sm:$0xff]   ;;  %v3230_v55 = vld [vmem:[#allocation2 + $0x320] ss:$16 sps:$4 sm:$0xff]  }
  0x56   :  { %1667 = vmatprep.subr.bf16.mxu0 %v3151_v56  ;;  %1831 = vmatprep.subr.bf16.mxu1 %v3153_v57  ;;  %v3233_v56 = vld [vmem:[#allocation2 + $0x328] ss:$16 sps:$4 sm:$0xff]   ;;  %v3238_v57 = vld [vmem:[#allocation2 + $0x344] ss:$16 sps:$4 sm:$0xff]  }
  0x59   :  { %1668 = vmatpush1.bf16.msra.mxu0 %v3155_v59  ;;  %1832 = vmatpush1.bf16.msra.mxu1 %v3156_v61  ;;  %v3236_v59 = vld [vmem:[#allocation2 + $0x340] ss:$16 sps:$4 sm:$0xff]   ;;  %v3244_v61 = vld [vmem:[#allocation2 + $0x364] ss:$16 sps:$4 sm:$0xff]  }
  0x5a   :  { %1669 = vmatprep.subr.bf16.mxu0 %v3157_v62  ;;  %1833 = vmatprep.subr.bf16.mxu1 %v3159_v63  ;;  %v3247_v62 = vld [vmem:[#allocation2 + $0x36c] ss:$16 sps:$4 sm:$0xff]   ;;  %v3242_v63 = vld [vmem:[#allocation2 + $0x360] ss:$16 sps:$4 sm:$0xff]  }
  0x5d   :  { %1670 = vmatpush1.bf16.msra.mxu0 %v3161_v0  ;;  %1834 = vmatpush1.bf16.msra.mxu1 %v3162_v1  ;;  %v3245_v0 = vld [vmem:[#allocation2 + $0x368] ss:$16 sps:$4 sm:$0xff]   ;;  %v3250_v1 = vld [vmem:[#allocation2 + $0x384] ss:$16 sps:$4 sm:$0xff]  }
  0x5e   :  { %1671 = vmatprep.subr.bf16.mxu0 %v3163_v2  ;;  %1835 = vmatprep.subr.bf16.mxu1 %v3165_v3  ;;  %v3253_v2 = vld [vmem:[#allocation2 + $0x38c] ss:$16 sps:$4 sm:$0xff]   ;;  %v3248_v3 = vld [vmem:[#allocation2 + $0x380] ss:$16 sps:$4 sm:$0xff]  }
  0x61   :  { %1672 = vmatpush1.bf16.msra.mxu0 %v3167_v5  ;;  %1836 = vmatpush1.bf16.msra.mxu1 %v3168_v6  ;;  %v3256_v5 = vld [vmem:[#allocation2 + $0x3a4] ss:$16 sps:$4 sm:$0xff]   ;;  %v3259_v6 = vld [vmem:[#allocation2 + $0x3ac] ss:$16 sps:$4 sm:$0xff]  }
  0x62   :  { %1673 = vmatprep.subr.bf16.mxu0 %v3169_v7  ;;  %1837 = vmatprep.subr.bf16.mxu1 %v3171_v8  ;;  %v3254_v7 = vld [vmem:[#allocation2 + $0x3a0] ss:$16 sps:$4 sm:$0xff]   ;;  %v3257_v8 = vld [vmem:[#allocation2 + $0x3a8] ss:$16 sps:$4 sm:$0xff]  }
  0x65   :  { %1674 = vmatpush1.bf16.msra.mxu0 %v3173_v10  ;;  %1838 = vmatpush1.bf16.msra.mxu1 %v3174_v11  ;;  %v3262_v10 = vld [vmem:[#allocation2 + $0x3c4] ss:$16 sps:$4 sm:$0xff]   ;;  %v3265_v11 = vld [vmem:[#allocation2 + $0x3cc] ss:$16 sps:$4 sm:$0xff]  }
  0x66   :  { %1684 = vmatprep.subr.bf16.mxu0 %v3178_v12  ;;  %1848 = vmatprep.subr.bf16.mxu1 %v3181_v13  ;;  %v3260_v12 = vld [vmem:[#allocation2 + $0x3c0] ss:$16 sps:$4 sm:$0xff]   ;;  %v3263_v13 = vld [vmem:[#allocation2 + $0x3c8] ss:$16 sps:$4 sm:$0xff]  }
  0x68   :  { %1676 = vmatmul.mubr.bf16.vlgmr.msra.gmra.mrb[0].mxu0 %v99_v16  ;;  %1840 = vmatmul.mubr.bf16.vlgmr.msra.gmra.mrb[0].mxu1 %v99_v16  ;;  %v3266_v16 = vld [vmem:[#allocation2 + $0x3e0] ss:$16 sps:$4 sm:$0xff]  }
  0x69   :  { %1685 = vmatpush1.bf16.msra.mxu0 %v3176_v15  ;;  %1849 = vmatpush1.bf16.msra.mxu1 %v3179_v17  ;;  %v3271_v15 = vld [vmem:[#allocation2 + $0x3ec] ss:$16 sps:$4 sm:$0xff]   ;;  %v3269_v17 = vld [vmem:[#allocation2 + $0x3e8] ss:$16 sps:$4 sm:$0xff]  }
  0x6a   :  { %1686 = vmatprep.subr.bf16.mxu0 %v3184_v18  ;;  %1850 = vmatprep.subr.bf16.mxu1 %v3187_v19  ;;  %v3274_v18 = vld [vmem:[#allocation2 + $0x404] ss:$16 sps:$4 sm:$0xff]   ;;  %v3277_v19 = vld [vmem:[#allocation2 + $0x40c] ss:$16 sps:$4 sm:$0xff]  }
  0x6b   :  { %1716 = vmatprep.mubr.bf16.mxu0 %v102_v20  ;;  %1880 = vmatprep.mubr.bf16.mxu1 %v102_v20  ;;  %v3272_v20 = vld [vmem:[#allocation2 + $0x400] ss:$16 sps:$4 sm:$0xff]  }
  0x6d   :  { %1687 = vmatpush1.bf16.msra.mxu0 %v3182_v21  ;;  %1851 = vmatpush1.bf16.msra.mxu1 %v3185_v22  ;;  %v101_v21 = vpack.c.bf16 %v3662_v9, %v3662_v9  ;;  %v3275_v22 = vld [vmem:[#allocation2 + $0x408] ss:$16 sps:$4 sm:$0xff]  }
  0x6e   :  { %1688 = vmatprep.subr.bf16.mxu0 %v3190_v23  ;;  %1852 = vmatprep.subr.bf16.mxu1 %v3193_v24  ;;  %v3671_v23 = vld [vmem:[%s3763_s0 + $0x8] sm:$0xff]  ;;  %v3280_v24 = vld [vmem:[#allocation2 + $0x424] ss:$16 sps:$4 sm:$0xff]  }
  0x71   :  { %1689 = vmatpush1.bf16.msra.mxu0 %v3188_v25  ;;  %1853 = vmatpush1.bf16.msra.mxu1 %v3191_v26  ;;  %v3283_v25 = vld [vmem:[#allocation2 + $0x42c] ss:$16 sps:$4 sm:$0xff]   ;;  %v3675_v26 = vrot.slane %v3671_v23, %v3655_v49 }
  0x72   :  { %1690 = vmatprep.subr.bf16.mxu0 %v3196_v27  ;;  %1854 = vmatprep.subr.bf16.mxu1 %v3199_v28  ;;  %v3278_v27 = vld [vmem:[#allocation2 + $0x420] ss:$16 sps:$4 sm:$0xff]   ;;  %v3281_v28 = vld [vmem:[#allocation2 + $0x428] ss:$16 sps:$4 sm:$0xff]  }
  0x73   :  { %v89_v9 = vcombine.high %v3675_v26, %v3675_v26 }
  0x75   :  { %1691 = vmatpush1.bf16.msra.mxu0 %v3194_v29  ;;  %1855 = vmatpush1.bf16.msra.mxu1 %v3197_v30  ;;  %v3286_v29 = vld [vmem:[#allocation2 + $0x444] ss:$16 sps:$4 sm:$0xff]   ;;  %v3289_v30 = vld [vmem:[#allocation2 + $0x44c] ss:$16 sps:$4 sm:$0xff]  }
  0x76   :  { %1692 = vmatprep.subr.bf16.mxu0 %v3202_v31  ;;  %1856 = vmatprep.subr.bf16.mxu1 %v3205_v32  ;;  %v104_v31 = vpack.c.bf16 %v89_v9, %v89_v9  ;;  %v3284_v32 = vld [vmem:[#allocation2 + $0x440] ss:$16 sps:$4 sm:$0xff]  }
  0x79   :  { %1693 = vmatpush1.bf16.msra.mxu0 %v3200_v33  ;;  %1857 = vmatpush1.bf16.msra.mxu1 %v3203_v34  ;;  %v3287_v33 = vld [vmem:[#allocation2 + $0x448] ss:$16 sps:$4 sm:$0xff]   ;;  %v3292_v34 = vld [vmem:[#allocation2 + $0x464] ss:$16 sps:$4 sm:$0xff]  }
  0x7a   :  { %1694 = vmatprep.subr.bf16.mxu0 %v3208_v35  ;;  %1858 = vmatprep.subr.bf16.mxu1 %v3211_v36  ;;  %v3295_v35 = vld [vmem:[#allocation2 + $0x46c] ss:$16 sps:$4 sm:$0xff]   ;;  %v3290_v36 = vld [vmem:[#allocation2 + $0x460] ss:$16 sps:$4 sm:$0xff]  }
  0x7d   :  { %1695 = vmatpush1.bf16.msra.mxu0 %v3206_v37  ;;  %1859 = vmatpush1.bf16.msra.mxu1 %v3209_v38  ;;  %v3293_v37 = vld [vmem:[#allocation2 + $0x468] ss:$16 sps:$4 sm:$0xff]   ;;  %v3298_v38 = vld [vmem:[#allocation2 + $0x484] ss:$16 sps:$4 sm:$0xff]  }
  0x7e   :  { %1696 = vmatprep.subr.bf16.mxu0 %v3214_v39  ;;  %1860 = vmatprep.subr.bf16.mxu1 %v3217_v40  ;;  %v3301_v39 = vld [vmem:[#allocation2 + $0x48c] ss:$16 sps:$4 sm:$0xff]   ;;  %v3296_v40 = vld [vmem:[#allocation2 + $0x480] ss:$16 sps:$4 sm:$0xff]  }
  0x81   :  { %1697 = vmatpush1.bf16.msra.mxu0 %v3212_v41  ;;  %1861 = vmatpush1.bf16.msra.mxu1 %v3215_v42  ;;  %v3299_v41 = vld [vmem:[#allocation2 + $0x488] ss:$16 sps:$4 sm:$0xff]   ;;  %v3304_v42 = vld [vmem:[#allocation2 + $0x4a4] ss:$16 sps:$4 sm:$0xff]  }
  0x82   :  { %1698 = vmatprep.subr.bf16.mxu0 %v3220_v44  ;;  %1862 = vmatprep.subr.bf16.mxu1 %v3223_v45  ;;  %v3307_v44 = vld [vmem:[#allocation2 + $0x4ac] ss:$16 sps:$4 sm:$0xff]   ;;  %v3302_v45 = vld [vmem:[#allocation2 + $0x4a0] ss:$16 sps:$4 sm:$0xff]  }
  0x85   :  { %1699 = vmatpush1.bf16.msra.mxu0 %v3218_v46  ;;  %1863 = vmatpush1.bf16.msra.mxu1 %v3221_v47  ;;  %v3305_v46 = vld [vmem:[#allocation2 + $0x4a8] ss:$16 sps:$4 sm:$0xff]   ;;  %v3310_v47 = vld [vmem:[#allocation2 + $0x4c4] ss:$16 sps:$4 sm:$0xff]  }
  0x86   :  { %1700 = vmatprep.subr.bf16.mxu0 %v3226_v48  ;;  %1864 = vmatprep.subr.bf16.mxu1 %v3229_v50  ;;  %v3313_v48 = vld [vmem:[#allocation2 + $0x4cc] ss:$16 sps:$4 sm:$0xff]   ;;  %v3308_v50 = vld [vmem:[#allocation2 + $0x4c0] ss:$16 sps:$4 sm:$0xff]  }
  0x89   :  { %1701 = vmatpush1.bf16.msra.mxu0 %v3224_v51  ;;  %1865 = vmatpush1.bf16.msra.mxu1 %v3227_v52  ;;  %v3311_v51 = vld [vmem:[#allocation2 + $0x4c8] ss:$16 sps:$4 sm:$0xff]   ;;  %v3316_v52 = vld [vmem:[#allocation2 + $0x4e4] ss:$16 sps:$4 sm:$0xff]  }
  0x8a   :  { %1702 = vmatprep.subr.bf16.mxu0 %v3232_v53  ;;  %1866 = vmatprep.subr.bf16.mxu1 %v3235_v54  ;;  %v3319_v53 = vld [vmem:[#allocation2 + $0x4ec] ss:$16 sps:$4 sm:$0xff]   ;;  %v3314_v54 = vld [vmem:[#allocation2 + $0x4e0] ss:$16 sps:$4 sm:$0xff]  }
  0x8d   :  { %1703 = vmatpush1.bf16.msra.mxu0 %v3230_v55  ;;  %1867 = vmatpush1.bf16.msra.mxu1 %v3233_v56  ;;  %v3317_v55 = vld [vmem:[#allocation2 + $0x4e8] ss:$16 sps:$4 sm:$0xff]   ;;  %v3322_v56 = vld [vmem:[#allocation2 + $0x504] ss:$16 sps:$4 sm:$0xff]  }
  0x8e   :  { %1704 = vmatprep.subr.bf16.mxu0 %v3238_v57  ;;  %1868 = vmatprep.subr.bf16.mxu1 %v3241_v58  ;;  %v3325_v57 = vld [vmem:[#allocation2 + $0x50c] ss:$16 sps:$4 sm:$0xff]   ;;  %v3320_v58 = vld [vmem:[#allocation2 + $0x500] ss:$16 sps:$4 sm:$0xff]  }
  0x91   :  { %1705 = vmatpush1.bf16.msra.mxu0 %v3236_v59  ;;  %1869 = vmatpush1.bf16.msra.mxu1 %v3239_v60  ;;  %v3323_v59 = vld [vmem:[#allocation2 + $0x508] ss:$16 sps:$4 sm:$0xff]   ;;  %v3328_v60 = vld [vmem:[#allocation2 + $0x524] ss:$16 sps:$4 sm:$0xff]  }
  0x92   :  { %1706 = vmatprep.subr.bf16.mxu0 %v3244_v61  ;;  %1870 = vmatprep.subr.bf16.mxu1 %v3247_v62  ;;  %v3331_v61 = vld [vmem:[#allocation2 + $0x52c] ss:$16 sps:$4 sm:$0xff]   ;;  %v3326_v62 = vld [vmem:[#allocation2 + $0x520] ss:$16 sps:$4 sm:$0xff]  }
  0x95   :  { %1707 = vmatpush1.bf16.msra.mxu0 %v3242_v63  ;;  %1871 = vmatpush1.bf16.msra.mxu1 %v3245_v0  ;;  %v3329_v63 = vld [vmem:[#allocation2 + $0x528] ss:$16 sps:$4 sm:$0xff]   ;;  %v3334_v0 = vld [vmem:[#allocation2 + $0x544] ss:$16 sps:$4 sm:$0xff]  }
  0x96   :  { %1708 = vmatprep.subr.bf16.mxu0 %v3250_v1  ;;  %1872 = vmatprep.subr.bf16.mxu1 %v3253_v2  ;;  %v3337_v1 = vld [vmem:[#allocation2 + $0x54c] ss:$16 sps:$4 sm:$0xff]   ;;  %v3332_v2 = vld [vmem:[#allocation2 + $0x540] ss:$16 sps:$4 sm:$0xff]  }
  0x99   :  { %1709 = vmatpush1.bf16.msra.mxu0 %v3248_v3  ;;  %1873 = vmatpush1.bf16.msra.mxu1 %v3251_v4  ;;  %v3335_v3 = vld [vmem:[#allocation2 + $0x548] ss:$16 sps:$4 sm:$0xff]   ;;  %v3340_v4 = vld [vmem:[#allocation2 + $0x564] ss:$16 sps:$4 sm:$0xff]  }
  0x9a   :  { %1710 = vmatprep.subr.bf16.mxu0 %v3256_v5  ;;  %1874 = vmatprep.subr.bf16.mxu1 %v3259_v6  ;;  %v3343_v5 = vld [vmem:[#allocation2 + $0x56c] ss:$16 sps:$4 sm:$0xff]   ;;  %v3338_v6 = vld [vmem:[#allocation2 + $0x560] ss:$16 sps:$4 sm:$0xff]  }
  0x9d   :  { %1711 = vmatpush1.bf16.msra.mxu0 %v3254_v7  ;;  %1875 = vmatpush1.bf16.msra.mxu1 %v3257_v8  ;;  %v3341_v7 = vld [vmem:[#allocation2 + $0x568] ss:$16 sps:$4 sm:$0xff]   ;;  %v3346_v8 = vld [vmem:[#allocation2 + $0x584] ss:$16 sps:$4 sm:$0xff]  }
  0x9e   :  { %1712 = vmatprep.subr.bf16.mxu0 %v3262_v10  ;;  %1876 = vmatprep.subr.bf16.mxu1 %v3265_v11  ;;  %v3349_v10 = vld [vmem:[#allocation2 + $0x58c] ss:$16 sps:$4 sm:$0xff]   ;;  %v3344_v11 = vld [vmem:[#allocation2 + $0x580] ss:$16 sps:$4 sm:$0xff]  }
  0xa1   :  { %1713 = vmatpush1.bf16.msra.mxu0 %v3260_v12  ;;  %1877 = vmatpush1.bf16.msra.mxu1 %v3263_v13  ;;  %v3347_v12 = vld [vmem:[#allocation2 + $0x588] ss:$16 sps:$4 sm:$0xff]   ;;  %v3352_v13 = vld [vmem:[#allocation2 + $0x5a4] ss:$16 sps:$4 sm:$0xff]  }
  0xa2   :  { %1714 = vmatprep.subr.bf16.mxu0 %v3268_v14  ;;  %1878 = vmatprep.subr.bf16.mxu1 %v3271_v15  ;;  %v3355_v14 = vld [vmem:[#allocation2 + $0x5ac] ss:$16 sps:$4 sm:$0xff]   ;;  %v3350_v15 = vld [vmem:[#allocation2 + $0x5a0] ss:$16 sps:$4 sm:$0xff]  }
  0xa5   :  { %1715 = vmatpush1.bf16.msra.mxu0 %v3266_v16  ;;  %1879 = vmatpush1.bf16.msra.mxu1 %v3269_v17  ;;  %v3353_v16 = vld [vmem:[#allocation2 + $0x5a8] ss:$16 sps:$4 sm:$0xff]   ;;  %v3358_v17 = vld [vmem:[#allocation2 + $0x5c4] ss:$16 sps:$4 sm:$0xff]  }
  0xa6   :  { %1725 = vmatprep.subr.bf16.mxu0 %v3274_v18  ;;  %1889 = vmatprep.subr.bf16.mxu1 %v3277_v19  ;;  %v3361_v18 = vld [vmem:[#allocation2 + $0x5cc] ss:$16 sps:$4 sm:$0xff]   ;;  %v3356_v19 = vld [vmem:[#allocation2 + $0x5c0] ss:$16 sps:$4 sm:$0xff]  }
  0xa8   :  { %1717 = vmatmul.mubr.bf16.vlgmr.msra.gmra.mrb[0].mxu0 %v101_v21  ;;  %1881 = vmatmul.mubr.bf16.vlgmr.msra.gmra.mrb[0].mxu1 %v101_v21  ;;  %v3359_v21 = vld [vmem:[#allocation2 + $0x5c8] ss:$16 sps:$4 sm:$0xff]  }
  0xa9   :  { %1726 = vmatpush1.bf16.msra.mxu0 %v3272_v20  ;;  %1890 = vmatpush1.bf16.msra.mxu1 %v3275_v22  ;;  %v74_v20 = vcombine.high %v3671_v23, %v3671_v23  ;;  %v3364_v22 = vld [vmem:[#allocation2 + $0x5e4] ss:$16 sps:$4 sm:$0xff]  }
  0xaa   :  { %1727 = vmatprep.subr.bf16.mxu0 %v3280_v24  ;;  %1891 = vmatprep.subr.bf16.mxu1 %v3283_v25  ;;  %v3367_v24 = vld [vmem:[#allocation2 + $0x5ec] ss:$16 sps:$4 sm:$0xff]   ;;  %v3362_v25 = vld [vmem:[#allocation2 + $0x5e0] ss:$16 sps:$4 sm:$0xff]  }
  0xab   :  { %1757 = vmatprep.mubr.bf16.mxu0 %v104_v31  ;;  %1921 = vmatprep.mubr.bf16.mxu1 %v104_v31  ;;  %v3682_v9 = vrot.slane %v74_v20, %v3655_v49  ;;  %v3371_v31 = vld [vmem:[#allocation2 + $0x608] ss:$16 sps:$4 sm:$0xff]   ;;  %v3448_v20 = vld [vmem:[#allocation2 + $0x7a4] ss:$16 sps:$4 sm:$0xff]  }
  0xad   :  { %1728 = vmatpush1.bf16.msra.mxu0 %v3278_v27  ;;  %1892 = vmatpush1.bf16.msra.mxu1 %v3281_v28  ;;  %v3365_v27 = vld [vmem:[#allocation2 + $0x5e8] ss:$16 sps:$4 sm:$0xff]   ;;  %v3370_v28 = vld [vmem:[#allocation2 + $0x604] ss:$16 sps:$4 sm:$0xff]   ;;  %v90_v23 = vcombine.high %v3682_v9, %v3682_v9 }
  0xae   :  { %1729 = vmatprep.subr.bf16.mxu0 %v3286_v29  ;;  %1893 = vmatprep.subr.bf16.mxu1 %v3289_v30  ;;  %v3373_v29 = vld [vmem:[#allocation2 + $0x60c] ss:$16 sps:$4 sm:$0xff]   ;;  %v3368_v30 = vld [vmem:[#allocation2 + $0x600] ss:$16 sps:$4 sm:$0xff]  }
  0xb1   :  { %1730 = vmatpush1.bf16.msra.mxu0 %v3284_v32  ;;  %1894 = vmatpush1.bf16.msra.mxu1 %v3287_v33  ;;  %v103_v32 = vpack.c.bf16 %v3675_v26, %v3675_v26  ;;  %v3376_v33 = vld [vmem:[#allocation2 + $0x624] ss:$16 sps:$4 sm:$0xff]  }
  0xb2   :  { %1731 = vmatprep.subr.bf16.mxu0 %v3292_v34  ;;  %1895 = vmatprep.subr.bf16.mxu1 %v3295_v35  ;;  %v3379_v34 = vld [vmem:[#allocation2 + $0x62c] ss:$16 sps:$4 sm:$0xff]   ;;  %v3374_v35 = vld [vmem:[#allocation2 + $0x620] ss:$16 sps:$4 sm:$0xff]   ;;  %v3388_v26 = vld [vmem:[#allocation2 + $0x664] ss:$16 sps:$4 sm:$0xff]  }
  0xb5   :  { %1732 = vmatpush1.bf16.msra.mxu0 %v3290_v36  ;;  %1896 = vmatpush1.bf16.msra.mxu1 %v3293_v37  ;;  %v106_v36 = vpack.c.bf16 %v90_v23, %v90_v23  ;;  %v3377_v37 = vld [vmem:[#allocation2 + $0x628] ss:$16 sps:$4 sm:$0xff]   ;;  %v3463_v23 = vld [vmem:[#allocation2 + $0x7ec] ss:$16 sps:$4 sm:$0xff]  }
  0xb6   :  { %1733 = vmatprep.subr.bf16.mxu0 %v3298_v38  ;;  %1897 = vmatprep.subr.bf16.mxu1 %v3301_v39  ;;  %v3382_v38 = vld [vmem:[#allocation2 + $0x644] ss:$16 sps:$4 sm:$0xff]   ;;  %v3385_v39 = vld [vmem:[#allocation2 + $0x64c] ss:$16 sps:$4 sm:$0xff]  }
  0xb9   :  { %1734 = vmatpush1.bf16.msra.mxu0 %v3296_v40  ;;  %1898 = vmatpush1.bf16.msra.mxu1 %v3299_v41  ;;  %v3380_v40 = vld [vmem:[#allocation2 + $0x640] ss:$16 sps:$4 sm:$0xff]   ;;  %v3383_v41 = vld [vmem:[#allocation2 + $0x648] ss:$16 sps:$4 sm:$0xff]  }
  0xba   :  { %1735 = vmatprep.subr.bf16.mxu0 %v3304_v42  ;;  %1899 = vmatprep.subr.bf16.mxu1 %v3307_v44  ;;  %v3391_v42 = vld [vmem:[#allocation2 + $0x66c] ss:$16 sps:$4 sm:$0xff]   ;;  %v3386_v44 = vld [vmem:[#allocation2 + $0x660] ss:$16 sps:$4 sm:$0xff]  }
  0xbd   :  { %1736 = vmatpush1.bf16.msra.mxu0 %v3302_v45  ;;  %1900 = vmatpush1.bf16.msra.mxu1 %v3305_v46  ;;  %v3389_v45 = vld [vmem:[#allocation2 + $0x668] ss:$16 sps:$4 sm:$0xff]   ;;  %v3394_v46 = vld [vmem:[#allocation2 + $0x684] ss:$16 sps:$4 sm:$0xff]  }
  0xbe   :  { %1737 = vmatprep.subr.bf16.mxu0 %v3310_v47  ;;  %1901 = vmatprep.subr.bf16.mxu1 %v3313_v48  ;;  %v3397_v47 = vld [vmem:[#allocation2 + $0x68c] ss:$16 sps:$4 sm:$0xff]   ;;  %v3392_v48 = vld [vmem:[#allocation2 + $0x680] ss:$16 sps:$4 sm:$0xff]  }
  0xc1   :  { %1738 = vmatpush1.bf16.msra.mxu0 %v3308_v50  ;;  %1902 = vmatpush1.bf16.msra.mxu1 %v3311_v51  ;;  %v3395_v50 = vld [vmem:[#allocation2 + $0x688] ss:$16 sps:$4 sm:$0xff]   ;;  %v3400_v51 = vld [vmem:[#allocation2 + $0x6a4] ss:$16 sps:$4 sm:$0xff]  }
  0xc2   :  { %1739 = vmatprep.subr.bf16.mxu0 %v3316_v52  ;;  %1903 = vmatprep.subr.bf16.mxu1 %v3319_v53  ;;  %v3403_v52 = vld [vmem:[#allocation2 + $0x6ac] ss:$16 sps:$4 sm:$0xff]   ;;  %v3398_v53 = vld [vmem:[#allocation2 + $0x6a0] ss:$16 sps:$4 sm:$0xff]  }
  0xc5   :  { %1740 = vmatpush1.bf16.msra.mxu0 %v3314_v54  ;;  %1904 = vmatpush1.bf16.msra.mxu1 %v3317_v55  ;;  %v3401_v54 = vld [vmem:[#allocation2 + $0x6a8] ss:$16 sps:$4 sm:$0xff]   ;;  %v3406_v55 = vld [vmem:[#allocation2 + $0x6c4] ss:$16 sps:$4 sm:$0xff]  }
  0xc6   :  { %1741 = vmatprep.subr.bf16.mxu0 %v3322_v56  ;;  %1905 = vmatprep.subr.bf16.mxu1 %v3325_v57  ;;  %v3409_v56 = vld [vmem:[#allocation2 + $0x6cc] ss:$16 sps:$4 sm:$0xff]   ;;  %v3404_v57 = vld [vmem:[#allocation2 + $0x6c0] ss:$16 sps:$4 sm:$0xff]  }
  0xc9   :  { %1742 = vmatpush1.bf16.msra.mxu0 %v3320_v58  ;;  %1906 = vmatpush1.bf16.msra.mxu1 %v3323_v59  ;;  %v3407_v58 = vld [vmem:[#allocation2 + $0x6c8] ss:$16 sps:$4 sm:$0xff]   ;;  %v3412_v59 = vld [vmem:[#allocation2 + $0x6e4] ss:$16 sps:$4 sm:$0xff]  }
  0xca   :  { %1743 = vmatprep.subr.bf16.mxu0 %v3328_v60  ;;  %1907 = vmatprep.subr.bf16.mxu1 %v3331_v61  ;;  %v3415_v60 = vld [vmem:[#allocation2 + $0x6ec] ss:$16 sps:$4 sm:$0xff]   ;;  %v3410_v61 = vld [vmem:[#allocation2 + $0x6e0] ss:$16 sps:$4 sm:$0xff]  }
  0xcd   :  { %1744 = vmatpush1.bf16.msra.mxu0 %v3326_v62  ;;  %1908 = vmatpush1.bf16.msra.mxu1 %v3329_v63  ;;  %v3413_v62 = vld [vmem:[#allocation2 + $0x6e8] ss:$16 sps:$4 sm:$0xff]   ;;  %v3418_v63 = vld [vmem:[#allocation2 + $0x704] ss:$16 sps:$4 sm:$0xff]  }
  0xce   :  { %1745 = vmatprep.subr.bf16.mxu0 %v3334_v0  ;;  %1909 = vmatprep.subr.bf16.mxu1 %v3337_v1  ;;  %v3421_v0 = vld [vmem:[#allocation2 + $0x70c] ss:$16 sps:$4 sm:$0xff]   ;;  %v3416_v1 = vld [vmem:[#allocation2 + $0x700] ss:$16 sps:$4 sm:$0xff]  }
  0xd1   :  { %1746 = vmatpush1.bf16.msra.mxu0 %v3332_v2  ;;  %1910 = vmatpush1.bf16.msra.mxu1 %v3335_v3  ;;  %v3419_v2 = vld [vmem:[#allocation2 + $0x708] ss:$16 sps:$4 sm:$0xff]   ;;  %v3424_v3 = vld [vmem:[#allocation2 + $0x724] ss:$16 sps:$4 sm:$0xff]  }
  0xd2   :  { %1747 = vmatprep.subr.bf16.mxu0 %v3340_v4  ;;  %1911 = vmatprep.subr.bf16.mxu1 %v3343_v5  ;;  %v3427_v4 = vld [vmem:[#allocation2 + $0x72c] ss:$16 sps:$4 sm:$0xff]   ;;  %v3422_v5 = vld [vmem:[#allocation2 + $0x720] ss:$16 sps:$4 sm:$0xff]  }
  0xd5   :  { %1748 = vmatpush1.bf16.msra.mxu0 %v3338_v6  ;;  %1912 = vmatpush1.bf16.msra.mxu1 %v3341_v7  ;;  %v3425_v6 = vld [vmem:[#allocation2 + $0x728] ss:$16 sps:$4 sm:$0xff]   ;;  %v3430_v7 = vld [vmem:[#allocation2 + $0x744] ss:$16 sps:$4 sm:$0xff]  }
  0xd6   :  { %1749 = vmatprep.subr.bf16.mxu0 %v3346_v8  ;;  %1913 = vmatprep.subr.bf16.mxu1 %v3349_v10  ;;  %v3433_v8 = vld [vmem:[#allocation2 + $0x74c] ss:$16 sps:$4 sm:$0xff]   ;;  %v3428_v10 = vld [vmem:[#allocation2 + $0x740] ss:$16 sps:$4 sm:$0xff]  }
  0xd9   :  { %1750 = vmatpush1.bf16.msra.mxu0 %v3344_v11  ;;  %1914 = vmatpush1.bf16.msra.mxu1 %v3347_v12  ;;  %v3431_v11 = vld [vmem:[#allocation2 + $0x748] ss:$16 sps:$4 sm:$0xff]   ;;  %v3436_v12 = vld [vmem:[#allocation2 + $0x764] ss:$16 sps:$4 sm:$0xff]  }
  0xda   :  { %1751 = vmatprep.subr.bf16.mxu0 %v3352_v13  ;;  %1915 = vmatprep.subr.bf16.mxu1 %v3355_v14  ;;  %v3439_v13 = vld [vmem:[#allocation2 + $0x76c] ss:$16 sps:$4 sm:$0xff]   ;;  %v3434_v14 = vld [vmem:[#allocation2 + $0x760] ss:$16 sps:$4 sm:$0xff]  }
  0xdd   :  { %1752 = vmatpush1.bf16.msra.mxu0 %v3350_v15  ;;  %1916 = vmatpush1.bf16.msra.mxu1 %v3353_v16  ;;  %v3437_v15 = vld [vmem:[#allocation2 + $0x768] ss:$16 sps:$4 sm:$0xff]   ;;  %v3442_v16 = vld [vmem:[#allocation2 + $0x784] ss:$16 sps:$4 sm:$0xff]  }
  0xde   :  { %1753 = vmatprep.subr.bf16.mxu0 %v3358_v17  ;;  %1917 = vmatprep.subr.bf16.mxu1 %v3361_v18  ;;  %v3445_v17 = vld [vmem:[#allocation2 + $0x78c] ss:$16 sps:$4 sm:$0xff]   ;;  %v3440_v18 = vld [vmem:[#allocation2 + $0x780] ss:$16 sps:$4 sm:$0xff]  }
  0xe1   :  { %1754 = vmatpush1.bf16.msra.mxu0 %v3356_v19  ;;  %1918 = vmatpush1.bf16.msra.mxu1 %v3359_v21  ;;  %v3443_v19 = vld [vmem:[#allocation2 + $0x788] ss:$16 sps:$4 sm:$0xff]   ;;  %v3451_v21 = vld [vmem:[#allocation2 + $0x7ac] ss:$16 sps:$4 sm:$0xff]  }
  0xe2   :  { %1755 = vmatprep.subr.bf16.mxu0 %v3364_v22  ;;  %1919 = vmatprep.subr.bf16.mxu1 %v3367_v24  ;;  %v3446_v22 = vld [vmem:[#allocation2 + $0x7a0] ss:$16 sps:$4 sm:$0xff]   ;;  %v3449_v24 = vld [vmem:[#allocation2 + $0x7a8] ss:$16 sps:$4 sm:$0xff]  }
  0xe5   :  { %1756 = vmatpush1.bf16.msra.mxu0 %v3362_v25  ;;  %1920 = vmatpush1.bf16.msra.mxu1 %v3365_v27  ;;  %v3454_v25 = vld [vmem:[#allocation2 + $0x7c4] ss:$16 sps:$4 sm:$0xff]   ;;  %v3457_v27 = vld [vmem:[#allocation2 + $0x7cc] ss:$16 sps:$4 sm:$0xff]  }
  0xe6   :  { %1766 = vmatprep.subr.bf16.mxu0 %v3370_v28  ;;  %1930 = vmatprep.subr.bf16.mxu1 %v3373_v29  ;;  %v3452_v28 = vld [vmem:[#allocation2 + $0x7c0] ss:$16 sps:$4 sm:$0xff]   ;;  %v3455_v29 = vld [vmem:[#allocation2 + $0x7c8] ss:$16 sps:$4 sm:$0xff]  }
  0xe8   :  { %1758 = vmatmul.mubr.bf16.vlgmr.msra.gmra.mrb[0].mxu0 %v103_v32  ;;  %1922 = vmatmul.mubr.bf16.vlgmr.msra.gmra.mrb[0].mxu1 %v103_v32  ;;  %v3461_v32 = vld [vmem:[#allocation2 + $0x7e8] ss:$16 sps:$4 sm:$0xff]  }
  0xe9   :  { %1767 = vmatpush1.bf16.msra.mxu0 %v3368_v30  ;;  %1931 = vmatpush1.bf16.msra.mxu1 %v3371_v31  ;;  %v3460_v30 = vld [vmem:[#allocation2 + $0x7e4] ss:$16 sps:$4 sm:$0xff]   ;;  %v3458_v31 = vld [vmem:[#allocation2 + $0x7e0] ss:$16 sps:$4 sm:$0xff]  }
  0xea   :  { %1768 = vmatprep.subr.bf16.mxu0 %v3376_v33  ;;  %1932 = vmatprep.subr.bf16.mxu1 %v3379_v34  ;;  %v3465_v33 = vld [vmem:[#allocation5 + $0x40] sm:$0xff]  }
  0xeb   :  { %1798 = vmatprep.mubr.bf16.mxu0 %v106_v36  ;;  %1962 = vmatprep.mubr.bf16.mxu1 %v106_v36  ;;  %v3466_v34 = vld [vmem:[#allocation5 + $0xc0] sm:$0xff]  }
  0xec   :  { %v3467_v36 = vld [vmem:[#allocation5] sm:$0xff]  }
  0xed   :  { %1769 = vmatpush1.bf16.msra.mxu0 %v3374_v35  ;;  %1933 = vmatpush1.bf16.msra.mxu1 %v3377_v37  ;;  %v105_v35 = vpack.c.bf16 %v3682_v9, %v3682_v9  ;;  %v3468_v37 = vld [vmem:[#allocation5 + $0x80] sm:$0xff]   ;;  %v3475_v9 = vld [vmem:[#allocation5 + $0x10] sm:$0xff]  }
  0xee   :  { %1770 = vmatprep.subr.bf16.mxu0 %v3382_v38  ;;  %1934 = vmatprep.subr.bf16.mxu1 %v3385_v39  ;;  %v3469_v38 = vld [vmem:[#allocation5 + $0x48] sm:$0xff]  }
  0xef   :  { %v3470_v39 = vld [vmem:[#allocation5 + $0xc8] sm:$0xff]  }
  0xf1   :  { %1771 = vmatpush1.bf16.msra.mxu0 %v3380_v40  ;;  %1935 = vmatpush1.bf16.msra.mxu1 %v3383_v41  ;;  %v3471_v40 = vld [vmem:[#allocation5 + $0x8] sm:$0xff]  }
  0xf2   :  { %1772 = vmatprep.subr.bf16.mxu0 %v3388_v26  ;;  %1936 = vmatprep.subr.bf16.mxu1 %v3391_v42  ;;  %v3472_v41 = vld [vmem:[#allocation5 + $0x88] sm:$0xff]   ;;  %v3473_v26 = vld [vmem:[#allocation5 + $0x50] sm:$0xff]  }
  0xf3   :  { %v3474_v42 = vld [vmem:[#allocation5 + $0xd0] sm:$0xff]  }
  0xf5   :  { %1773 = vmatpush1.bf16.msra.mxu0 %v3386_v44  ;;  %1937 = vmatpush1.bf16.msra.mxu1 %v3389_v45  ;;  %v3476_v44 = vld [vmem:[#allocation5 + $0x90] sm:$0xff]   ;;  %v3477_v45 = vld [vmem:[#allocation5 + $0x58] sm:$0xff]  }
  0xf6   :  { %1774 = vmatprep.subr.bf16.mxu0 %v3394_v46  ;;  %1938 = vmatprep.subr.bf16.mxu1 %v3397_v47  ;;  %v3478_v46 = vld [vmem:[#allocation5 + $0xd8] sm:$0xff]  }
  0xf7   :  { %v3479_v47 = vld [vmem:[#allocation5 + $0x18] sm:$0xff]  }
  0xf9   :  { %1775 = vmatpush1.bf16.msra.mxu0 %v3392_v48  ;;  %1939 = vmatpush1.bf16.msra.mxu1 %v3395_v50  ;;  %v3480_v48 = vld [vmem:[#allocation5 + $0x98] sm:$0xff]   ;;  %v3481_v50 = vld [vmem:[#allocation5 + $0x60] sm:$0xff]  }
  0xfa   :  { %1776 = vmatprep.subr.bf16.mxu0 %v3400_v51  ;;  %1940 = vmatprep.subr.bf16.mxu1 %v3403_v52  ;;  %v3482_v51 = vld [vmem:[#allocation5 + $0xe0] sm:$0xff]  }
  0xfb   :  { %v3483_v52 = vld [vmem:[#allocation5 + $0x20] sm:$0xff]  }
  0xfd   :  { %1777 = vmatpush1.bf16.msra.mxu0 %v3398_v53  ;;  %1941 = vmatpush1.bf16.msra.mxu1 %v3401_v54  ;;  %v3484_v53 = vld [vmem:[#allocation5 + $0xa0] sm:$0xff]   ;;  %v3485_v54 = vld [vmem:[#allocation5 + $0x68] sm:$0xff]  }
  0xfe   :  { %1778 = vmatprep.subr.bf16.mxu0 %v3406_v55  ;;  %1942 = vmatprep.subr.bf16.mxu1 %v3409_v56  ;;  %v3486_v55 = vld [vmem:[#allocation5 + $0xe8] sm:$0xff]  }
  0xff   :  { %v3487_v56 = vld [vmem:[#allocation5 + $0x28] sm:$0xff]  }
 0x101   :  { %1779 = vmatpush1.bf16.msra.mxu0 %v3404_v57  ;;  %1943 = vmatpush1.bf16.msra.mxu1 %v3407_v58  ;;  %v3488_v57 = vld [vmem:[#allocation5 + $0xa8] sm:$0xff]   ;;  %v3489_v58 = vld [vmem:[#allocation5 + $0x70] sm:$0xff]  }
 0x102   :  { %1780 = vmatprep.subr.bf16.mxu0 %v3412_v59  ;;  %1944 = vmatprep.subr.bf16.mxu1 %v3415_v60  ;;  %v3490_v59 = vld [vmem:[#allocation5 + $0xf0] sm:$0xff]  }
 0x103   :  { %v3491_v60 = vld [vmem:[#allocation5 + $0x30] sm:$0xff]  }
 0x105   :  { %1781 = vmatpush1.bf16.msra.mxu0 %v3410_v61  ;;  %1945 = vmatpush1.bf16.msra.mxu1 %v3413_v62  ;;  %v3492_v61 = vld [vmem:[#allocation5 + $0xb0] sm:$0xff]   ;;  %v3493_v62 = vld [vmem:[#allocation5 + $0x78] sm:$0xff]  }
 0x106   :  { %1782 = vmatprep.subr.bf16.mxu0 %v3418_v63  ;;  %1946 = vmatprep.subr.bf16.mxu1 %v3421_v0  ;;  %v3494_v63 = vld [vmem:[#allocation5 + $0xf8] sm:$0xff]  }
 0x107   :  { %v3495_v0 = vld [vmem:[#allocation5 + $0x38] sm:$0xff]  }
 0x109   :  { %1783 = vmatpush1.bf16.msra.mxu0 %v3416_v1  ;;  %1947 = vmatpush1.bf16.msra.mxu1 %v3419_v2  ;;  %v3496_v1 = vld [vmem:[#allocation5 + $0xb8] sm:$0xff]   ;;  %v3589_v2 = vmov 0.0  }
 0x10a   :  { %1784 = vmatprep.subr.bf16.mxu0 %v3424_v3  ;;  %1948 = vmatprep.subr.bf16.mxu1 %v3427_v4 }
 0x10d   :  { %1785 = vmatpush1.bf16.msra.mxu0 %v3422_v5  ;;  %1949 = vmatpush1.bf16.msra.mxu1 %v3425_v6 }
 0x10e   :  { %1786 = vmatprep.subr.bf16.mxu0 %v3430_v7  ;;  %1950 = vmatprep.subr.bf16.mxu1 %v3433_v8 }
 0x111   :  { %1787 = vmatpush1.bf16.msra.mxu0 %v3428_v10  ;;  %1951 = vmatpush1.bf16.msra.mxu1 %v3431_v11 }
 0x112   :  { %1788 = vmatprep.subr.bf16.mxu0 %v3436_v12  ;;  %1952 = vmatprep.subr.bf16.mxu1 %v3439_v13 }
 0x115   :  { %1789 = vmatpush1.bf16.msra.mxu0 %v3434_v14  ;;  %1953 = vmatpush1.bf16.msra.mxu1 %v3437_v15 }
 0x116   :  { %1790 = vmatprep.subr.bf16.mxu0 %v3442_v16  ;;  %1954 = vmatprep.subr.bf16.mxu1 %v3445_v17 }
 0x119   :  { %1791 = vmatpush1.bf16.msra.mxu0 %v3440_v18  ;;  %1955 = vmatpush1.bf16.msra.mxu1 %v3443_v19  ;;  %v3497_v18 = vld [vmem:[%s3766_s3] sm:$0xff]  }
 0x11a   :  { %1792 = vmatprep.subr.bf16.mxu0 %v3448_v20  ;;  %1956 = vmatprep.subr.bf16.mxu1 %v3451_v21  ;;  %v3498_v21 = vld [vmem:[%s3766_s3 + $0x8] sm:$0xff]  }
 0x11d   :  { %1793 = vmatpush1.bf16.msra.mxu0 %v3446_v22  ;;  %1957 = vmatpush1.bf16.msra.mxu1 %v3449_v24  ;;  %v3499_v22 = vld [vmem:[%s3766_s3 + $0x10] sm:$0xff]   ;;  %v3500_v24 = vld [vmem:[%s3766_s3 + $0x18] sm:$0xff]  }
 0x11e   :  { %1794 = vmatprep.subr.bf16.mxu0 %v3454_v25  ;;  %1958 = vmatprep.subr.bf16.mxu1 %v3457_v27  ;;  %v3501_v25 = vld [vmem:[%s3766_s3 + $0x20] sm:$0xff]   ;;  %v3502_v27 = vld [vmem:[%s3766_s3 + $0x28] sm:$0xff]  }
 0x121   :  { %1795 = vmatpush1.bf16.msra.mxu0 %v3452_v28  ;;  %1959 = vmatpush1.bf16.msra.mxu1 %v3455_v29  ;;  %v3503_v28 = vld [vmem:[%s3766_s3 + $0x30] sm:$0xff]   ;;  %v3504_v29 = vld [vmem:[%s3766_s3 + $0x38] sm:$0xff]  }
 0x122   :  { %1796 = vmatprep.subr.bf16.mxu0 %v3460_v30  ;;  %1960 = vmatprep.subr.bf16.mxu1 %v3463_v23  ;;  %v2422_v30 = vld [vmem:[%s3767_s4] sm:$0xff] }
 0x123   :  { %v2953_v23 = vcombine.high %v2422_v30, %v2422_v30 }
 0x125   :  { %1797 = vmatpush1.bf16.msra.mxu0 %v3458_v31  ;;  %1961 = vmatpush1.bf16.msra.mxu1 %v3461_v32  ;;  %v2952_v31 = vcombine.low %v2422_v30, %v2422_v30 }
 0x126   :  { %2963 = vmatprep.subr.bf16.mxu0 %v3465_v33  ;;  %2985 = vmatprep.subr.bf16.mxu1 %v3466_v34 }
 0x127   :  { %v2471_v32 = vsel %vm2469_vm1, %v2952_v31, 0 }
 0x128   :  { %1799 = vmatmul.mubr.bf16.vlgmr.msra.gmra.mrb[0].mxu0 %v105_v35  ;;  %1963 = vmatmul.mubr.bf16.vlgmr.msra.gmra.mrb[0].mxu1 %v105_v35 }
 0x129   :  { %2964 = vmatpush3.bf16.msra.mxu0 %v3467_v36  ;;  %2986 = vmatpush3.bf16.msra.mxu1 %v3468_v37 }
 0x12a   :  { %2965 = vmatprep.subr.bf16.mxu0 %v3469_v38  ;;  %2987 = vmatprep.subr.bf16.mxu1 %v3470_v39 }
 0x12d   :  { %2966 = vmatpush3.bf16.msra.mxu0 %v3471_v40  ;;  %2988 = vmatpush3.bf16.msra.mxu1 %v3472_v41 }
 0x12e   :  { %2967 = vmatprep.subr.bf16.mxu0 %v3473_v26  ;;  %2989 = vmatprep.subr.bf16.mxu1 %v3474_v42 }
 0x131   :  { %2968 = vmatpush3.bf16.msra.mxu0 %v3475_v9  ;;  %2990 = vmatpush3.bf16.msra.mxu1 %v3476_v44 }
 0x132   :  { %2969 = vmatprep.subr.bf16.mxu0 %v3477_v45  ;;  %2991 = vmatprep.subr.bf16.mxu1 %v3478_v46  ;;  %v3591_v45 = vmov 0   ;;  %v2423_v46 = vld [vmem:[%s3767_s4 + $0x8] sm:$0xff] }
 0x135   :  { %2970 = vmatpush3.bf16.msra.mxu0 %v3479_v47  ;;  %2992 = vmatpush3.bf16.msra.mxu1 %v3480_v48  ;;  %v2955_v47 = vcombine.high %v2423_v46, %v2423_v46  ;;  %v2954_v48 = vcombine.low %v2423_v46, %v2423_v46 }
 0x136   :  { %2971 = vmatprep.subr.bf16.mxu0 %v3481_v50  ;;  %2993 = vmatprep.subr.bf16.mxu1 %v3482_v51 }
 0x139   :  { %2972 = vmatpush3.bf16.msra.mxu0 %v3483_v52  ;;  %2994 = vmatpush3.bf16.msra.mxu1 %v3484_v53  ;;  %v2477_v53 = vsel %vm2469_vm1, %v2954_v48, 0 }
 0x13a   :  { %2973 = vmatprep.subr.bf16.mxu0 %v3485_v54  ;;  %2995 = vmatprep.subr.bf16.mxu1 %v3486_v55 }
 0x13d   :  { %2974 = vmatpush3.bf16.msra.mxu0 %v3487_v56  ;;  %2996 = vmatpush3.bf16.msra.mxu1 %v3488_v57  ;;  %v3509_v56 = vld [vmem:[%s3767_s4 + $0x10] ss:$0 sps:$4 sm:$0xff]   ;;  %s3592_s4 = smov [#allocation7]  }
 0x13e   :  { %2975 = vmatprep.subr.bf16.mxu0 %v3489_v58  ;;  %2997 = vmatprep.subr.bf16.mxu1 %v3490_v59  ;;  %v2483_v57 = vsel %vm2469_vm1, %v3509_v56, 0  ;;  %v2429_v58 = vsub.s32 0, %v3652_v43  ;;  %v2425_v59 = vld [vmem:[%s3768_s5] sm:$0x1f]  ;;  %s2646_s5 = sshll.u32 %s3592_s4, 4  ;;  %s2647_s5 = int_to_ptr.vmem [resolvable:$true] %s2646_s5 }
 0x13f   :  { %s3554_s2 = scalar_lea.vmem %s2647_s5, 160  ;;  %p3559_p3 = scmp.lt.s32.totalorder %s2647_s5, %s2647_s5 }
 0x140   :  { %p3555_p2 = scmp.ne.s32.totalorder %s2647_s5, %s3554_s2  ;;  %p3560_p4 = scmp.lt.s32.totalorder %s3554_s2, %s3554_s2 }
 0x141   :  { %2976 = vmatpush3.bf16.msra.mxu0 %v3491_v60  ;;  %2998 = vmatpush3.bf16.msra.mxu1 %v3492_v61  ;;  %v2433_v60 = vsub.s32 1, %v3652_v43  ;;  %v2430_v61 = vrot.slane %v2425_v59, %v2429_v58 }
 0x142   :  { %2977 = vmatprep.subr.bf16.mxu0 %v3493_v62  ;;  %2999 = vmatprep.subr.bf16.mxu1 %v3494_v63  ;;  %p3561_p5 = por %p3560_p4, %p3559_p3 }
 0x143   :  { %v2434_v62 = vrot.slane %v2425_v59, %v2433_v60 }
 0x144   :  { %p3562_p6 = pnand %p3561_p5, %p3555_p2 }
 0x145   :  { %2978 = vmatpush3.bf16.msra.mxu0 %v3495_v0  ;;  %3000 = vmatpush3.bf16.msra.mxu1 %v3496_v1 }
 0x146   :  { %3018 = vmatprep.subr.bf16.mxu0 %v3589_v2  ;;  %2957 = vmatprep.subr.msk.bf16.mxu1 %vm2469_vm1, %v2953_v23 }
 0x1fb   :  { %v1800_v3 = vpop.f32.mrb[0].mxu0  ;;  %v1964_v4 = vpop.f32.mrb[0].mxu1 }
 0x1fc   :  { %v1971_v5 = vmax.f32 %v1800_v3, 0.0  ;;  %v1973_v6 = vmax.f32 %v1964_v4, 0.0  ;;  %v1802_v7 = vpop.f32.mrb[1].mxu0  ;;  %v1966_v8 = vpop.f32.mrb[1].mxu1  ;;  %v2437_v3 = vsub.s32 2, %v3652_v43 }
 0x1fd   :  { %v1972_v10 = vmax.f32 %v1802_v7, 0.0  ;;  %v1974_v11 = vmax.f32 %v1966_v8, 0.0  ;;  %v1804_v12 = vpop.f32.mrb[2].mxu0  ;;  %v1968_v13 = vpop.f32.mrb[2].mxu1 }
 0x1fe   :  { %v1805_v14 = vpop.f32.mrb[3].mxu0  ;;  %v1969_v15 = vpop.f32.mrb[3].mxu1  ;;  %v1975_v19 = vpack.c.bf16 %v1971_v5, %v1971_v5  ;;  %v1977_v20 = vpack.c.bf16 %v1973_v6, %v1973_v6  ;;  %v2438_v8 = vrot.slane %v2425_v59, %v2437_v3 }
 0x1ff   :  { %v1976_v16 = vpack.c.bf16 %v1972_v10, %v1972_v10  ;;  %v1978_v17 = vpack.c.bf16 %v1974_v11, %v1974_v11  ;;  %v2445_v14 = vsub.s32 4, %v3652_v43 }
 0x201   :  { %2267 = vmatprep.mubr.bf16.mxu0 %v1976_v16  ;;  %2307 = vmatprep.mubr.bf16.mxu1 %v1978_v17 }
 0x202   :  { %2268 = vmatmul.mubr.bf16.vlgmr.msra.gmra.mrb[4].mxu0 %v1975_v19  ;;  %2308 = vmatmul.mubr.bf16.vlgmr.msra.gmra.mrb[4].mxu1 %v1977_v20  ;;  %v2446_v19 = vrot.slane %v2425_v59, %v2445_v14 }
 0x203   :  { %3019 = vmatpush3.bf16.msra.mxu0 %v3497_v18  ;;  %3034 = vmatprep.mubr.msk.bf16.mxu0 %vm3590_vm0, %v3589_v2 }
 0x204   :  { %3020 = vmatprep.subr.bf16.mxu0 %v3589_v2  ;;  %2486 = vmatpush1.bf16.msra.mxu1 %v2471_v32 }
 0x205   :  { %2517 = vmatprep.mubr.bf16.mxu1 %v3591_v45  ;;  %2959 = vmatprep.subr.msk.bf16.mxu1 %vm2469_vm1, %v2955_v47 }
 0x207   :  { %3021 = vmatpush3.bf16.msra.mxu0 %v3498_v21 }
 0x208   :  { %3022 = vmatprep.subr.bf16.mxu0 %v3589_v2 }
 0x20b   :  { %3023 = vmatpush3.bf16.msra.mxu0 %v3499_v22 }
 0x20c   :  { %3024 = vmatprep.subr.bf16.mxu0 %v3589_v2 }
 0x20f   :  { %3025 = vmatpush3.bf16.msra.mxu0 %v3500_v24 }
 0x210   :  { %3026 = vmatprep.subr.bf16.mxu0 %v3589_v2 }
 0x213   :  { %3027 = vmatpush3.bf16.msra.mxu0 %v3501_v25 }
 0x214   :  { %3028 = vmatprep.subr.bf16.mxu0 %v3589_v2 }
 0x217   :  { %3029 = vmatpush3.bf16.msra.mxu0 %v3502_v27 }
 0x218   :  { %3030 = vmatprep.subr.bf16.mxu0 %v3589_v2 }
 0x21b   :  { %3031 = vmatpush3.bf16.msra.mxu0 %v3503_v28 }
 0x21c   :  { %3032 = vmatprep.subr.bf16.mxu0 %v3589_v2 }
 0x21f   :  { %3033 = vmatpush3.bf16.msra.mxu0 %v3504_v29 }
 0x2d5   :  { %v2979_v33 = vpop.f32.mrb[4].mxu0  ;;  %v3001_v34 = vpop.f32.mrb[4].mxu1 }
 0x2d6   :  { %v2980_v35 = vpop.f32.mrb[5].mxu0  ;;  %v3002_v36 = vpop.f32.mrb[5].mxu1 }
 0x2d7   :  { %v2981_v37 = vadd.f32 %v2980_v35, %v2979_v33  ;;  %v3003_v38 = vadd.f32 %v3002_v36, %v3001_v34  ;;  %v2982_v39 = vpop.f32.mrb[6].mxu0  ;;  %v3004_v40 = vpop.f32.mrb[6].mxu1 }
 0x2d8   :  { %v2983_v41 = vpop.f32.mrb[7].mxu0  ;;  %v3005_v26 = vpop.f32.mrb[7].mxu1 }
 0x2d9   :  { %v2310_v42 = vadd.f32 %v3003_v38, %v2981_v37 }
 0x2db   :  { %v2315_v9 = vmax.f32 %v2310_v42, 0.0 }
 0x2dd   :  { %v2316_v44 = vpack.c.bf16 %v2315_v9, %v2315_v9 }
 0x2df   :  { %3035 = vmatmul.mubr.bf16.vlgmr.msra.gmra.mrb[8].mxu0 %v2316_v44 }
 0x3b2   :  { %v2415_v50 = vpop.f32.mrb[8].mxu0 }
 0x3b3   :  { %v2421_v51 = vpack.c.bf16 %v2415_v50, %v2415_v50  ;;  %v3036_v52 = vpop.f32.mrb[9].mxu0 }
 0x3b4   :  { %v2418_v54 = vpop.f32.mrb[10].mxu0 }
 0x3b5   :  { %v3037_v55 = vpop.f32.mrb[11].mxu0  ;;  %2958 = vmatmul.mubr.msk.bf16.vlgmr.msra.gmra.mrb[8].mxu1 %vm2465_vm2, %v2421_v51 }
 0x3b6   :  { %2527 = vmatpush1.bf16.msra.mxu1 %v2477_v53  ;;  %2558 = vmatprep.mubr.bf16.mxu1 %v3591_v45 }
 0x3b7   :  { %3038 = vmatprep.subr.bf16.mxu1 %v3589_v2 }
 0x3bd   :  { %2960 = vmatmul.mubr.msk.bf16.vlgmr.msra.gmra.mrb[12].mxu1 %vm2465_vm2, %v2421_v51 }
 0x3be   :  { %3039 = vmatpush3.bf16.msra.mxu1 %v2483_v57  ;;  %3040 = vmatprep.mubr.msk.bf16.mxu1 %vm3590_vm0, %v3589_v2  ;;  %v2441_v2 = vsub.s32 3, %v3652_v43 }
 0x3c0   :  { %v2442_v10 = vrot.slane %v2425_v59, %v2441_v2 }
 0x3c5   :  { %3041 = vmatmul.mubr.msk.bf16.vlgmr.msra.gmra.mrb[16].mxu1 %vm2465_vm2, %v2421_v51 }
 0x488   :  { %v2519_v63 = vpop.f32.mrb[8].mxu1 }
 0x489   :  { %v2520_v0 = vadd.f32 %v2519_v63, %v2430_v61  ;;  %v2521_v1 = vpop.f32.mrb[9].mxu1 }
 0x48a   :  { %v2522_v4 = vadd.f32 %v2521_v1, %v2434_v62  ;;  %v2523_v5 = vpop.f32.mrb[10].mxu1 }
 0x48b   :  { %v2524_v6 = vpop.f32.mrb[11].mxu1 }
 0x48c   :  { %v2612_v7 = vcombine.low %v2520_v0, %v2522_v4 }
 0x48e   :  { %v2620_v20 = vrot.slane %v2612_v7, %v3655_v49 }
 0x490   :  { %v2560_v11 = vpop.f32.mrb[12].mxu1 }
 0x491   :  { %v2561_v12 = vadd.f32 %v2560_v11, %v2438_v8  ;;  %v2562_v13 = vpop.f32.mrb[13].mxu1 }
 0x492   :  { %v2563_v15 = vadd.f32 %v2562_v13, %v2442_v10  ;;  %v2564_v16 = vpop.f32.mrb[14].mxu1 }
 0x493   :  { %v2565_v17 = vpop.f32.mrb[15].mxu1 }
 0x494   :  { %v2613_v18 = vcombine.low %v2561_v12, %v2563_v15 }
 0x496   :  { %v2627_v21 = vrot.slane %v2613_v18, %v3655_v49 }
 0x498   :  { %v2601_v22 = vpop.f32.mrb[16].mxu1  ;;  %v2628_v24 = vcombine.low %v2620_v20, %v2627_v21 }
 0x499   :  { %v2602_v25 = vadd.f32 %v2601_v22, %v2446_v19  ;;  %v3042_v27 = vpop.f32.mrb[17].mxu1 }
 0x49a   :  { %v2604_v28 = vpop.f32.mrb[18].mxu1  ;;  %2638 = vst [vmem:[#allocation7] sm:$0xff] %v2628_v24 }
 0x49b   :  { %2962 = vst.sshfl [vmem:[#allocation7 + $0x8] sm:$0x3 pattern:$0x76325410] %v2602_v25  ;;  %v3043_v43 = vpop.f32.mrb[19].mxu1 }
 0x49c   :  { %3565 = shalt.err (!%p3562_p6)
}
 0x49d   :  { %s3566_s26 = scalar_lea.hbm %s3769_s6, 160 }
 0x49e   :  { %p3567_p7 = scmp.ne.s32.totalorder %s3769_s6, %s3566_s26  ;;  %p3570_p8 = scmp.lt.u32.totalorder %s3566_s26, %s3769_s6 }
 0x4a0   :  { %p3572_p9 = pnand %p3570_p8, %p3567_p7 }
 0x4a2   :  { %3575 = shalt.err (!%p3572_p9)
}
 0x4a3   :  { %2649 = dma.vmem_to_hbm [thread:$0]  %s2647_s5, 160, %s3769_s6, [#allocation4]  }
 0x4a4   :  { %3580 = dma.done.wait [#allocation4], 160  }
 0x4a5   :  { %3581 = vsyncadd [#allocation4], 4294967136 }
 0x4a6   :  { %2653 = vsyncpa [#allocation3], 1 }
 0x4a7   :  { %2654 = vsyncpa [#allocation6], 1 }
 0x4a8   :  { %2655 = vsyncpa [#allocation4], 1 }

</bundles_post_ra>
